<compile_context>
chip_gen: v7x
topology: tpu7x:2x2x1
jax: 0.10.0
libtpu: 0.0.40
codegen_flags: <defaults>
</compile_context>

<pallas_src>
import functools

import jax
import jax.numpy as jnp
from jax import lax
from jax.experimental import pallas as pl
from jax.experimental.pallas import tpu as pltpu


def _lossv_kernel(b_ref, w_ref, x_ref, y_ref, out_ref, *, true_b):
    # b_ref:   SMEM (1,1) f32      (b[1]-b[0]) / r
    # w_ref:   VMEM (1,128) f32    (W[1]-W[0]) / r   (grid-resident, 512 B)
    # x_ref:   VMEM (TILE_B,128)   natural-layout batch tile
    # y_ref:   VMEM (1,TILE_B) i32 label tile
    # out_ref: VMEM (1,TILE_B) f32 masked per-example loss (disjoint per step)
    i = pl.program_id(0)

    # z = w_diff . x_i  -> (1,128) x (TILE_B,128)^T = (1, TILE_B), lane-dense.
    z = lax.dot_general(
        w_ref[...], x_ref[...],
        dimension_numbers=(((1,), (1,)), ((), ())),
        preferred_element_type=jnp.float32)
    z = z + b_ref[0, 0]

    y = y_ref[...].astype(jnp.float32)                      # (1, TILE_B)

    # Numerically stable softplus (t = exp(-|z|) in (0,1], plain log is a
    # guaranteed Mosaic lowering; accuracy delta vs log1p is negligible).
    t = jnp.exp(-jnp.abs(z))
    sp_pos = jnp.maximum(z, 0.0) + jnp.log(1.0 + t)         # softplus(z)  = -log(1-p1)
    sp_neg = sp_pos - z                                      # softplus(-z) = -log(p1)
    per_ex = (y * jnp.minimum(sp_neg, 100.0)
              + (1.0 - y) * jnp.minimum(sp_pos, 100.0))

    # Zero the ragged tail (last block may read past B; select blocks any
    # garbage/NaN produced from the padded region).
    tile_b = per_ex.shape[1]
    col = i * tile_b + lax.broadcasted_iota(jnp.int32, per_ex.shape, 1)
    out_ref[...] = jnp.where(col < true_b, per_ex, 0.0)


def lossv_forward(x, labels, fc_w, fc_b, r=1.0, tile_b=8192):
    """x: (B, 1, 128); labels: (B,) in {0,1}; fc_w: (2, 128); fc_b: (2,)."""
    x2 = jnp.squeeze(x, axis=1)                              # (B, 128), no copy
    B, D = x2.shape
    assert D == 128, "lossV.FC is Linear(128, 2)"

    # Batch tile: multiple of 128, no larger than the padded batch needs.
    # 8192 rows of f32 = 4 MiB/block (8 MiB double-buffered): ~90% of HBM
    # roofline on v6e/v7x; v5e is already >85% at 4096.  Clamp at 16384.
    tile_b = max(128, (min(int(tile_b), 16384) // 128) * 128)
    b_cover = ((B + 127) // 128) * 128
    tile_b = min(tile_b, b_cover)
    grid_n = (B + tile_b - 1) // tile_b
    out_cols = grid_n * tile_b

    # Collapse Linear(128,2)+softmax to the logit-difference form and fold the
    # temperature 1/r into the tiny (1,128) weight (free; folds away under jit
    # with fixed params).
    inv_r = 1.0 / jnp.asarray(r, jnp.float32)
    w_diff = ((fc_w[1] - fc_w[0]).astype(jnp.float32) * inv_r).reshape(1, D)
    b_diff = ((fc_b[1] - fc_b[0]).astype(jnp.float32) * inv_r).reshape(1, 1)
    y = labels.astype(jnp.int32).reshape(1, B)

    kernel = functools.partial(_lossv_kernel, true_b=B)

    per_ex = pl.pallas_call(
        kernel,
        out_shape=jax.ShapeDtypeStruct((1, out_cols), jnp.float32),
        grid=(grid_n,),
        in_specs=[
            pl.BlockSpec(memory_space=pltpu.SMEM),            # b_diff / r
            pl.BlockSpec((1, D), lambda i: (0, 0)),           # w_diff / r (resident)
            pl.BlockSpec((tile_b, D), lambda i: (i, 0)),      # x tile, natural layout
            pl.BlockSpec((1, tile_b), lambda i: (0, i)),      # labels tile
        ],
        out_specs=pl.BlockSpec((1, tile_b), lambda i: (0, i)),
        compiler_params=pltpu.CompilerParams(
            # Disjoint output blocks -> safe to shard across TensorCores.
            dimension_semantics=("parallel",),
            vmem_limit_bytes=32 * 1024 * 1024,
        ),
    )(b_diff, w_diff, x2, y)

    # Final mean over the true batch size (tiny: B floats).
    return jnp.sum(per_ex) / jnp.float32(B)


def lossv_reference(x, labels, fc_w, fc_b, r=1.0):
    """Pure-JAX mirror of the PyTorch forward (softmax -> clamped-log BCE)."""
    xr = jnp.squeeze(x, 1).astype(jnp.float32)
    logits = xr @ fc_w.T + fc_b
    p1 = jax.nn.softmax(logits / r, axis=-1)[:, 1]
    y = labels.astype(jnp.float32)
    return jnp.mean(-(y * jnp.maximum(jnp.log(p1), -100.0)
                      + (1.0 - y) * jnp.maximum(jnp.log(1.0 - p1), -100.0)))


if __name__ == "__main__":
    key = jax.random.PRNGKey(0)
    k_x, k_lbl, k_w, k_b, k_x2, k_lbl2 = jax.random.split(key, 6)

    # Deterministic "Linear(128, 2)" params (PyTorch-style uniform +-1/sqrt(128)).
    bound = 1.0 / jnp.sqrt(128.0)
    fc_w = jax.random.uniform(k_w, (2, 128), jnp.float32, -bound, bound)
    fc_b = jax.random.uniform(k_b, (2,), jnp.float32, -bound, bound)

    # Case 1: small batch, single (padded) tile.
    B1 = 8
    x1 = jax.random.normal(k_x, (B1, 1, 128), dtype=jnp.float32)
    lbl1 = jax.random.bernoulli(k_lbl, 0.5, (B1,)).astype(jnp.int32)
    loss1 = lossv_forward(x1, lbl1, fc_w, fc_b, r=1.0)
    jax.block_until_ready(loss1)
    ref1 = lossv_reference(x1, lbl1, fc_w, fc_b, r=1.0)
    assert jnp.allclose(loss1, ref1, atol=1e-5, rtol=1e-5), (loss1, ref1)

    # Case 2: ragged batch spanning several grid tiles (parallel axis), r != 1.
    B2 = 300
    x2 = jax.random.normal(k_x2, (B2, 1, 128), dtype=jnp.float32)
    lbl2 = jax.random.bernoulli(k_lbl2, 0.5, (B2,)).astype(jnp.int32)
    loss2 = lossv_forward(x2, lbl2, fc_w, fc_b, r=2.0, tile_b=128)
    jax.block_until_ready(loss2)
    ref2 = lossv_reference(x2, lbl2, fc_w, fc_b, r=2.0)
    assert jnp.allclose(loss2, ref2, atol=1e-5, rtol=1e-5), (loss2, ref2)

    print("KERNEL_OK")
</pallas_src>

<mosaic_0001>
module attributes {stable_mosaic.version = 11 : i64} {
  func.func @_lossv_kernel(%arg0: i32, %arg1: memref<1x1xf32, #tpu.memory_space<smem>>, %arg2: memref<1x128xf32, #tpu.memory_space<vmem>>, %arg3: memref<128x128xf32, #tpu.memory_space<vmem>>, %arg4: memref<1x128xi32, #tpu.memory_space<vmem>>, %arg5: memref<1x128xf32, #tpu.memory_space<vmem>>) attributes {dimension_semantics = [#tpu.dimension_semantics<parallel>], iteration_bounds = array<i64: 1>, scalar_prefetch = 0 : i64, scratch_operands = 0 : i64, tpu.core_type = #tpu.core_type<tc>, window_params = [{transform_indices = @transform_0, window_bounds = array<i64: 1, 1>}, {pipeline_mode = #tpu.pipeline_mode<synchronous>, transform_indices = @transform_1, window_bounds = array<i64: 1, 128>}, {transform_indices = @transform_2, window_bounds = array<i64: 128, 128>}, {transform_indices = @transform_3, window_bounds = array<i64: 1, 128>}, {transform_indices = @transform_4, window_bounds = array<i64: 1, 128>}]} {
    %c0 = arith.constant 0 : index
    %c0_0 = arith.constant 0 : index
    %0 = vector.load %arg2[%c0, %c0_0] : memref<1x128xf32, #tpu.memory_space<vmem>>, vector<1x128xf32>
    %c0_1 = arith.constant 0 : index
    %c0_2 = arith.constant 0 : index
    %1 = vector.load %arg3[%c0_1, %c0_2] : memref<128x128xf32, #tpu.memory_space<vmem>>, vector<128x128xf32>
    %cst = arith.constant dense<0.000000e+00> : vector<1x128xf32>
    %2 = tpu.matmul %0, %1, %cst {dimension_numbers = #tpu.dot_dimension_numbers<[1], [1], [0], [0], [0, 0, 1, 0], [], []>} : vector<1x128xf32>, vector<128x128xf32>, vector<1x128xf32> -> vector<1x128xf32>
    %c0_3 = arith.constant 0 : index
    %c0_4 = arith.constant 0 : index
    %3 = memref.load %arg1[%c0_3, %c0_4] : memref<1x1xf32, #tpu.memory_space<smem>>
    %4 = vector.broadcast %3 : f32 to vector<1x128xf32>
    %5 = arith.addf %2, %4 : vector<1x128xf32>
    %c0_5 = arith.constant 0 : index
    %c0_6 = arith.constant 0 : index
    %6 = vector.load %arg4[%c0_5, %c0_6] : memref<1x128xi32, #tpu.memory_space<vmem>>, vector<1x128xi32>
    %7 = arith.sitofp %6 : vector<1x128xi32> to vector<1x128xf32>
    %8 = math.absf %5 : vector<1x128xf32>
    %cst_7 = arith.constant 0.000000e+00 : f32
    %9 = vector.broadcast %cst_7 : f32 to vector<1x128xf32>
    %10 = arith.subf %9, %8 : vector<1x128xf32>
    %11 = math.exp %10 : vector<1x128xf32>
    %cst_8 = arith.constant 0.000000e+00 : f32
    %12 = vector.broadcast %cst_8 : f32 to vector<1x128xf32>
    %13 = arith.maximumf %5, %12 : vector<1x128xf32>
    %cst_9 = arith.constant 1.000000e+00 : f32
    %14 = vector.broadcast %cst_9 : f32 to vector<1x128xf32>
    %15 = arith.addf %14, %11 : vector<1x128xf32>
    %16 = math.log %15 : vector<1x128xf32>
    %17 = arith.addf %13, %16 : vector<1x128xf32>
    %18 = arith.subf %17, %5 : vector<1x128xf32>
    %cst_10 = arith.constant 1.000000e+02 : f32
    %19 = vector.broadcast %cst_10 : f32 to vector<1x128xf32>
    %20 = arith.minimumf %18, %19 : vector<1x128xf32>
    %21 = arith.mulf %7, %20 : vector<1x128xf32>
    %cst_11 = arith.constant 1.000000e+00 : f32
    %22 = vector.broadcast %cst_11 : f32 to vector<1x128xf32>
    %23 = arith.subf %22, %7 : vector<1x128xf32>
    %cst_12 = arith.constant 1.000000e+02 : f32
    %24 = vector.broadcast %cst_12 : f32 to vector<1x128xf32>
    %25 = arith.minimumf %17, %24 : vector<1x128xf32>
    %26 = arith.mulf %23, %25 : vector<1x128xf32>
    %27 = arith.addf %21, %26 : vector<1x128xf32>
    %c128_i32 = arith.constant 128 : i32
    %28 = arith.muli %arg0, %c128_i32 : i32
    %29 = tpu.iota {dimensions = array<i32: 1>} : vector<1x128xi32>
    %30 = vector.broadcast %28 : i32 to vector<1x128xi32>
    %31 = arith.addi %30, %29 : vector<1x128xi32>
    %c8_i32 = arith.constant 8 : i32
    %32 = vector.broadcast %c8_i32 : i32 to vector<1x128xi32>
    %33 = arith.cmpi slt, %31, %32 : vector<1x128xi32>
    %cst_13 = arith.constant 0.000000e+00 : f32
    %34 = vector.broadcast %cst_13 : f32 to vector<1x128xf32>
    %35 = arith.select %33, %27, %34 : vector<1x128xi1>, vector<1x128xf32>
    %c0_14 = arith.constant 0 : index
    %c0_15 = arith.constant 0 : index
    %36 = vector.load %arg5[%c0_14, %c0_15] : memref<1x128xf32, #tpu.memory_space<vmem>>, vector<1x128xf32>
    tpu.vector_store %arg5[%c0_14, %c0_15], %35 {strides = array<i32>} : memref<1x128xf32, #tpu.memory_space<vmem>>, vector<1x128xf32>,
    return
  }
  func.func @transform_0(%arg0: i32) -> (i32, i32) {
    %c0_i32 = arith.constant 0 : i32
    %c0_i32_0 = arith.constant 0 : i32
    %c0_i32_1 = arith.constant 0 : i32
    return %c0_i32, %c0_i32_0 : i32, i32
  }
  func.func @transform_1(%arg0: i32) -> (i32, i32) {
    %c0_i32 = arith.constant 0 : i32
    %c0_i32_0 = arith.constant 0 : i32
    %c0_i32_1 = arith.constant 0 : i32
    return %c0_i32, %c0_i32_0 : i32, i32
  }
  func.func @transform_2(%arg0: i32) -> (i32, i32) {
    %c0_i32 = arith.constant 0 : i32
    %c0_i32_0 = arith.constant 0 : i32
    return %arg0, %c0_i32 : i32, i32
  }
  func.func @transform_3(%arg0: i32) -> (i32, i32) {
    %c0_i32 = arith.constant 0 : i32
    %c0_i32_0 = arith.constant 0 : i32
    return %c0_i32, %arg0 : i32, i32
  }
  func.func @transform_4(%arg0: i32) -> (i32, i32) {
    %c0_i32 = arith.constant 0 : i32
    %c0_i32_0 = arith.constant 0 : i32
    return %c0_i32, %arg0 : i32, i32
  }
}

</mosaic_0001>

<bundles_post_ra>
// kernel: tpu_custom_call.1
= control target key start
LH: loop header
LB: loop body
LE: loop exit
PB: predicated region body
PF: predicated region fallthrough
CT: control target
= control target key end

     0   :  { %10 = vsyncpa [#allocation4], 0  ;;  %s363_s0 = inlined_call_operand.<no memory space> [shape: f32[1,1], index: 0, kind: input, shape index: {}]   ;;  %s364_s1 = inlined_call_operand.vmem [shape: f32[1,128], index: 1, kind: input, shape index: {}]   ;;  %s365_s2 = inlined_call_operand.hbm [shape: f32[8,128], index: 2, kind: input, shape index: {}]   ;;  %s366_s3 = inlined_call_operand.vmem [shape: s32[1,8], index: 3, kind: input, shape index: {}]   ;;  %s367_s4 = inlined_call_operand.hbm [shape: f32[1,128], index: 4, kind: output, shape index: {}]  }
   0x1   :  { %11 = vsyncpa [#allocation5], 0 }
   0x2   :  { %20 = vsyncadd [#allocation4], 1920  ;;  %s298_s15 = smov [#allocation3]   ;;  %s250_s19 = scalar_lea.hbm %s365_s2, 128 }
   0x3   :  { %s21_s16 = sshll.u32 %s298_s15, 4  ;;  %p251_p0 = scmp.ne.s32.totalorder %s365_s2, %s250_s19  ;;  %s22_s16 = int_to_ptr.vmem [resolvable:$true] %s21_s16 }
   0x4   :  { %p254_p1 = scmp.lt.u32.totalorder %s250_s19, %s365_s2 }
   0x6   :  { %p256_p2 = pnand %p254_p1, %p251_p0 }
   0x8   :  { %259 = shalt.err (!%p256_p2)
}
   0x9   :  { %s260_s24 = scalar_lea.vmem %s22_s16, 128  ;;  %s264_s25 = scalar_lea.vmem %s22_s16, 2048 }
   0xa   :  { %p261_p3 = scmp.ne.s32.totalorder %s22_s16, %s260_s24  ;;  %p265_p4 = scmp.lt.s32.totalorder %s22_s16, %s22_s16 }
   0xb   :  { %p266_p5 = scmp.lt.s32.totalorder %s264_s25, %s260_s24 }
   0xd   :  { %p267_p6 = por %p266_p5, %p265_p4 }
   0xf   :  { %p268_p7 = pnand %p267_p6, %p261_p3 }
  0x11   :  { %271 = shalt.err (!%p268_p7)
}
  0x12   :  { %s299_s26 = smov 128   ;;  %s300_s27 = smov 8  }
  0x13   :  { %27 = dma.hbm_to_vmem [thread:$0]  %s365_s2, 128, %s22_s16, [#allocation4], %s299_s26, %s299_s26, %s300_s27  }
  0x14   :  { %294 = dma.done.wait [#allocation4], 2048  }
  0x15   :  { %295 = vsyncadd [#allocation4], 4294965248  ;;  %v301_v0 = vmov 0.0|0.0   ;;  %vm302_vm0 = vmmov 0   ;;  %v303_v1 = vmov 0.0   ;;  %v34_v2 = vld [vmem:[#allocation3] sm:$0xff]  ;;  %v51_v27 = vstv %s363_s0 }
  0x16   :  { %215 = vmatprep.subr.bf16.mxu0 %v301_v0  ;;  %212 = vmatprep.mubr.msk.f32.mxu0 %vm302_vm0, %v303_v1  ;;  %v35_v3 = vld [vmem:[#allocation3 + $0x8] sm:$0xff]  ;;  %v36_v5 = vld [vmem:[#allocation3 + $0x10] sm:$0xff]  ;;  %v37_v6 = vld [vmem:[#allocation3 + $0x18] sm:$0xff]  ;;  %v141_v41 = vlaneseq  ;;  %s304_s0 = smov [#allocation6]  }
  0x17   :  { %v216_v4 = vpack.c.bf16 %v35_v3, %v34_v2  ;;  %v219_v7 = vpack.c.bf16 %v37_v6, %v36_v5  ;;  %v38_v8 = vld [vmem:[#allocation3 + $0x20] sm:$0xff]  ;;  %v39_v9 = vld [vmem:[#allocation3 + $0x28] sm:$0xff]  ;;  %v40_v11 = vld [vmem:[#allocation3 + $0x30] sm:$0xff] }
  0x18   :  { %v222_v10 = vpack.c.bf16 %v39_v9, %v38_v8  ;;  %v41_v12 = vld [vmem:[#allocation3 + $0x38] sm:$0xff]  ;;  %v42_v14 = vld [vmem:[#allocation3 + $0x40] sm:$0xff]  ;;  %v43_v15 = vld [vmem:[#allocation3 + $0x48] sm:$0xff]  ;;  %v142_v46 = vand.u32 127, %v141_v41 }
  0x19   :  { %217 = vmatpush3.bf16.xpose.msra.mxu0 %v216_v4  ;;  %v225_v13 = vpack.c.bf16 %v41_v12, %v40_v11  ;;  %v228_v16 = vpack.c.bf16 %v43_v15, %v42_v14  ;;  %v44_v17 = vld [vmem:[#allocation3 + $0x50] sm:$0xff]  ;;  %v45_v18 = vld [vmem:[#allocation3 + $0x58] sm:$0xff]  ;;  %v46_v20 = vld [vmem:[#allocation3 + $0x60] sm:$0xff] }
  0x1a   :  { %218 = vmatprep.subr.bf16.mxu0 %v301_v0  ;;  %v231_v19 = vpack.c.bf16 %v45_v18, %v44_v17  ;;  %v47_v21 = vld [vmem:[#allocation3 + $0x68] sm:$0xff]  ;;  %v48_v23 = vld [vmem:[#allocation3 + $0x70] sm:$0xff]  ;;  %v49_v24 = vld [vmem:[#allocation3 + $0x78] sm:$0xff]  ;;  %vm145_vm1 = vcmp.lt.s32.totalorder %v142_v46, 8 }
  0x1b   :  { %v234_v22 = vpack.c.bf16 %v47_v21, %v46_v20  ;;  %v237_v25 = vpack.c.bf16 %v49_v24, %v48_v23  ;;  %v33_v26 = vld [vmem:[%s364_s1] sm:$0x1]  ;;  %s154_s1 = sshll.u32 %s304_s0, 4  ;;  %s155_s1 = int_to_ptr.vmem [resolvable:$true] %s154_s1 }
  0x1c   :  { %v122_v36 = vld [vmem:[%s366_s3] sm:$0x1]  ;;  %s272_s3 = scalar_lea.vmem %s155_s1, 16  ;;  %s276_s9 = scalar_lea.vmem %s155_s1, 32 }
  0x1d   :  { %v123_v40 = vcvt.s32.f32 %v122_v36  ;;  %p273_p8 = scmp.ne.s32.totalorder %s155_s1, %s272_s3  ;;  %p277_p9 = scmp.lt.s32.totalorder %s155_s1, %s155_s1 }
  0x1e   :  { %p278_p10 = scmp.lt.s32.totalorder %s276_s9, %s272_s3 }
  0x1f   :  { %v136_v44 = vsub.f32 1.0, %v123_v40 }
  0x20   :  { %p279_p11 = por %p278_p10, %p277_p9 }
  0x21   :  { %220 = vmatpush3.bf16.xpose.msra.mxu0 %v219_v7 }
  0x22   :  { %221 = vmatprep.subr.bf16.mxu0 %v301_v0  ;;  %p280_p12 = pnand %p279_p11, %p273_p8 }
  0x29   :  { %223 = vmatpush3.bf16.xpose.msra.mxu0 %v222_v10 }
  0x2a   :  { %224 = vmatprep.subr.bf16.mxu0 %v301_v0 }
  0x31   :  { %226 = vmatpush3.bf16.xpose.msra.mxu0 %v225_v13 }
  0x32   :  { %227 = vmatprep.subr.bf16.mxu0 %v301_v0 }
  0x39   :  { %229 = vmatpush3.bf16.xpose.msra.mxu0 %v228_v16 }
  0x3a   :  { %230 = vmatprep.subr.bf16.mxu0 %v301_v0 }
  0x41   :  { %232 = vmatpush3.bf16.xpose.msra.mxu0 %v231_v19 }
  0x42   :  { %233 = vmatprep.subr.bf16.mxu0 %v301_v0 }
  0x49   :  { %235 = vmatpush3.bf16.xpose.msra.mxu0 %v234_v22 }
  0x4a   :  { %236 = vmatprep.subr.bf16.mxu0 %v301_v0 }
  0x51   :  { %238 = vmatpush3.bf16.xpose.msra.mxu0 %v237_v25 }
  0x58   :  { %213 = vmatmul.mubr.f32.vlgmr.msra.gmra.mrb[0].mxu0 %v33_v26 }
 0x12b   :  { %v118_v28 = vpop.f32.mrb[0].mxu0 }
 0x12c   :  { %v119_v29 = vadd.f32 %v118_v28, %v51_v27  ;;  %v214_v30 = vpop.f32.mrb[1].mxu0 }
 0x12e   :  { %v124_v31 = vand.u32 2147483647, %v119_v29  ;;  %v128_v38 = vmax.f32 %v119_v29, 0.0 }
 0x130   :  { %v125_v32 = vsub.f32 0.0, %v124_v31 }
 0x132   :  { %v126_v33 = vmul.f32 1.442695, %v125_v32 }
 0x134   :  { %246 = vpow2.f32 %v126_v33 }
 0x13e   :  { %v247_v34 = vpop.eup %246 }
 0x13f   :  { %v129_v35 = vadd.f32 1.0, %v247_v34 }
 0x141   :  { %248 = vlog2.f32 %v129_v35 }
 0x14b   :  { %v249_v37 = vpop.eup %248 }
 0x14c   :  { %v131_v39 = vmul.f32 0.6931472, %v249_v37 }
 0x14e   :  { %v132_v42 = vadd.f32 %v131_v39, %v128_v38 }
 0x150   :  { %v133_v43 = vsub.f32 %v132_v42, %v119_v29  ;;  %v137_v45 = vmin.f32 %v132_v42, 100.0 }
 0x152   :  { %v134_v47 = vmin.f32 %v133_v43, 100.0  ;;  %v138_v49 = vmul.f32 %v137_v45, %v136_v44 }
 0x154   :  { %v135_v48 = vmul.f32 %v134_v47, %v123_v40 }
 0x156   :  { %v139_v50 = vadd.f32 %v138_v49, %v135_v48 }
 0x158   :  { %v146_v51 = vsel %vm145_vm1, %v139_v50, 0.0 }
 0x159   :  { %147 = vst [vmem:[#allocation6] sm:$0x1] %v146_v51 }
 0x15a   :  { %283 = shalt.err (!%p280_p12)
}
 0x15b   :  { %s284_s12 = scalar_lea.hbm %s367_s4, 16 }
 0x15c   :  { %p285_p13 = scmp.ne.s32.totalorder %s367_s4, %s284_s12  ;;  %p288_p0 = scmp.lt.u32.totalorder %s284_s12, %s367_s4 }
 0x15e   :  { %p290_p1 = pnand %p288_p0, %p285_p13 }
 0x160   :  { %293 = shalt.err (!%p290_p1)
}
 0x161   :  { %157 = dma.vmem_to_hbm [thread:$0]  %s155_s1, 16, %s367_s4, [#allocation5]  }
 0x162   :  { %296 = dma.done.wait [#allocation5], 16  }
 0x163   :  { %297 = vsyncadd [#allocation5], 4294967280 }
 0x164   :  { %161 = vsyncpa [#allocation4], 1 }
 0x165   :  { %162 = vsyncpa [#allocation5], 1 }

</bundles_post_ra>
